<compile_context>
chip_gen: v7x
topology: tpu7x:2x2x1
jax: 0.10.0
libtpu: 0.0.40
codegen_flags: <defaults>
</compile_context>

<pallas_src>
import jax
import jax.numpy as jnp
from jax import lax
from jax.experimental import pallas as pl
from jax.experimental.pallas import tpu as pltpu


def _gelu_tanh(x):
    # tanh-approximate GELU: 0.5*x*(1 + tanh(sqrt(2/pi)*(x + 0.044715*x^3)))
    # TODO(synk): PyTorch nn.GELU() defaults to the exact erf formulation.
    c = 0.7978845608028654  # sqrt(2/pi)
    return 0.5 * x * (1.0 + jnp.tanh(c * (x + 0.044715 * x * x * x)))


# ----------------------------------------------------------------------------
# Depthwise path (groups == C): lane-fused (N, H, W*C) layout.
# ----------------------------------------------------------------------------
def _make_depthwise_kernel(*, Bn, H, W, C, KH, KW, ph, pw, dh, dw, Ho, Wo, RT):
    Hp, Wp = H + 2 * ph, W + 2 * pw
    WC, WpC, WoC = W * C, Wp * C, Wo * C
    n_rg = Ho // RT

    def kernel(x_ref, scale_ref, shift_ref, w_ref, o_ref, pad_ref):
        # ---- BatchNorm (folded scale/shift) + GELU, in f32 (v5e-safe) ------
        x = x_ref[...].astype(jnp.float32)                     # (Bn, H, W*C)
        scale = scale_ref[...].reshape(1, 1, WC)
        shift = shift_ref[...].reshape(1, 1, WC)
        y = _gelu_tanh(x * scale + shift)

        # ---- conv zero padding: zero ONLY the thin border strips ----------
        # The interior is fully overwritten every grid step; zeroing the whole
        # scratch would add a full block-sized store per step.  Border zeroing
        # every step is megacore-safe (each core has its own scratch).
        if ph > 0:
            pad_ref[:, 0:ph, :] = jnp.zeros((Bn, ph, WpC), jnp.float32)
            pad_ref[:, ph + H:Hp, :] = jnp.zeros((Bn, ph, WpC), jnp.float32)
        if pw > 0:
            pad_ref[:, ph:ph + H, 0:pw * C] = jnp.zeros((Bn, H, pw * C), jnp.float32)
            pad_ref[:, ph:ph + H, (pw + W) * C:WpC] = jnp.zeros((Bn, H, pw * C),
                                                                jnp.float32)
        pad_ref[:, ph:ph + H, pw * C:(pw + W) * C] = y

        # ---- depthwise conv: sum over KH*KW taps, one store per row-group --
        w_all = w_ref[...]                                     # (KH*KW, Wo*C)
        w_taps = [w_all[t].reshape(1, 1, WoC) for t in range(KH * KW)]  # hoisted

        def conv_rows(r0):
            acc = jnp.zeros((Bn, RT, WoC), jnp.float32)
            t = 0
            for i in range(KH):
                for j in range(KW):
                    patch = pad_ref[:, pl.ds(r0 + i * dh, RT),
                                    j * dw * C:j * dw * C + WoC]
                    acc = acc + patch * w_taps[t]
                    t += 1
            # lane-dense (multiple-of-128 when C*Wo is) unmasked store
            o_ref[:, pl.ds(r0, RT), :] = acc.astype(o_ref.dtype)

        if n_rg <= 8:
            # small images: fully static slices / stores
            for rg in range(n_rg):
                conv_rows(rg * RT)
        else:
            # large images: fori_loop bounds the accumulator's live range
            def body(rg, carry):
                conv_rows(pl.multiple_of(rg * RT, RT))
                return carry
            lax.fori_loop(0, n_rg, body, 0)

    return kernel


# ----------------------------------------------------------------------------
# Dense path (groups == 1): im2col + single bf16 MXU matmul (K = KH*KW*Cin).
# ----------------------------------------------------------------------------
def _make_dense_kernel(*, Bn, H, W, Cin, Cout, KH, KW, ph, pw, dh, dw, Ho, Wo):
    Hp, Wp = H + 2 * ph, W + 2 * pw
    K = KH * KW * Cin

    def kernel(x_ref, scale_ref, shift_ref, w_ref, o_ref, pad_ref, col_ref):
        x = x_ref[...].astype(jnp.float32)                      # (Bn, H, W, Cin)
        scale = scale_ref[...].reshape(1, 1, 1, Cin)
        shift = shift_ref[...].reshape(1, 1, 1, Cin)
        y = _gelu_tanh(x * scale + shift)

        # zero only the border strips of the persistent pad scratch
        if ph > 0:
            pad_ref[:, 0:ph, :, :] = jnp.zeros((Bn, ph, Wp, Cin), jnp.float32)
            pad_ref[:, ph + H:Hp, :, :] = jnp.zeros((Bn, ph, Wp, Cin), jnp.float32)
        if pw > 0:
            pad_ref[:, ph:ph + H, 0:pw, :] = jnp.zeros((Bn, H, pw, Cin), jnp.float32)
            pad_ref[:, ph:ph + H, pw + W:Wp, :] = jnp.zeros((Bn, H, pw, Cin),
                                                            jnp.float32)
        pad_ref[:, ph:ph + H, pw:pw + W, :] = y

        # im2col into a VMEM scratch, then ONE MXU matmul with K = KH*KW*Cin
        t = 0
        for i in range(KH):
            for j in range(KW):
                col_ref[:, :, :, t * Cin:(t + 1) * Cin] = \
                    pad_ref[:, i * dh:i * dh + Ho, j * dw:j * dw + Wo, :]
                t += 1
        col = col_ref[...].reshape(Bn * Ho * Wo, K).astype(jnp.bfloat16)
        out = jnp.dot(col, w_ref[...], preferred_element_type=jnp.float32)
        o_ref[...] = out.reshape(Bn, Ho, Wo, Cout).astype(o_ref.dtype)

    return kernel


def _pick_bn(N, per_image_bytes, budget=24 << 20):
    """Largest batch-pack Bn (divisor of N) that fits the live-VMEM budget while
    keeping the grid length >= 2 (preferably even) so both v7x TensorCores work."""
    fits = [b for b in range(1, N + 1)
            if N % b == 0 and b * per_image_bytes <= budget]
    if not fits:
        # TODO(synk): spatial (halo) tiling when a single image exceeds the budget.
        return 1
    for pred in ((lambda b: (N // b) >= 2 and (N // b) % 2 == 0),
                 (lambda b: (N // b) >= 2),
                 (lambda b: True)):
        cand = [b for b in fits if pred(b)]
        if cand:
            return max(cand)
    return 1


def bn_activ_conv(x_nchw, conv_weight, bn_weight, bn_bias, bn_mean, bn_var, *,
                  kernel_size, stride=(1, 1), dilation=(1, 1), groups=1, eps=1e-5):
    """Fused BN(eval) -> GELU -> Conv2d(bias=False). x_nchw: (N, C, H, W)."""
    N, Cin, H, W = x_nchw.shape
    KH, KW = kernel_size
    sh, sw = stride
    dh, dw = dilation
    assert (sh, sw) == (1, 1), "only stride (1,1) supported"  # TODO(synk): strided conv
    Cout = conv_weight.shape[0]
    assert bn_weight.shape[0] == Cin

    # PyTorch padding formula from the module (int() truncation preserved).
    ph = int((dh * (KH - 1) - sh + 1) / 2)
    pw = int((dw * (KW - 1) - sw + 1) / 2)
    Ho = H + 2 * ph - dh * (KH - 1)
    Wo = W + 2 * pw - dw * (KW - 1)
    Hp, Wp = H + 2 * ph, W + 2 * pw

    # Fold inference-mode BatchNorm into a per-channel scale/shift.
    bn_scale = bn_weight.astype(jnp.float32) / jnp.sqrt(bn_var.astype(jnp.float32) + eps)
    bn_shift = bn_bias.astype(jnp.float32) - bn_mean.astype(jnp.float32) * bn_scale

    out_dtype = x_nchw.dtype
    depthwise = (groups == Cin == Cout)
    budget = 24 << 20  # live-VMEM target per grid step

    if depthwise:
        # --- lane-fused (N, H, W*C) layout: channels fill the lane axis -----
        x = jnp.transpose(x_nchw, (0, 2, 3, 1)).reshape(N, H, W * Cin)
        scale = jnp.tile(bn_scale, W).reshape(1, W * Cin)
        shift = jnp.tile(bn_shift, W).reshape(1, W * Cin)
        # (C, 1, KH, KW) -> (KH*KW, C) -> tile across Wo -> (KH*KW, Wo*C)
        w_taps = jnp.transpose(conv_weight[:, 0, :, :], (1, 2, 0)).reshape(KH * KW, Cin)
        w = jnp.tile(w_taps, (1, Wo)).astype(jnp.float32)

        # Budget: 2x double-buffered input + 2x output blocks + pad scratch + f32 temp.
        per_img = 4 * (2 * H * W * Cin + 2 * Ho * Wo * Cout
                       + Hp * Wp * Cin + H * W * Cin)
        Bn = _pick_bn(N, per_img, budget)
        # Row-group size: keep the per-group f32 accumulator within ~16 vregs.
        RT = 1
        for r in range(1, Ho + 1):
            if Ho % r == 0 and Bn * r * Wo * Cout * 4 <= (64 << 10):
                RT = r
        est = Bn * per_img

        kernel = _make_depthwise_kernel(Bn=Bn, H=H, W=W, C=Cin, KH=KH, KW=KW,
                                        ph=ph, pw=pw, dh=dh, dw=dw,
                                        Ho=Ho, Wo=Wo, RT=RT)
        out = pl.pallas_call(
            kernel,
            out_shape=jax.ShapeDtypeStruct((N, Ho, Wo * Cout), out_dtype),
            grid=(N // Bn,),
            in_specs=[
                pl.BlockSpec((Bn, H, W * Cin), lambda n: (n, 0, 0)),
                pl.BlockSpec((1, W * Cin), lambda n: (0, 0)),
                pl.BlockSpec((1, W * Cin), lambda n: (0, 0)),
                pl.BlockSpec((KH * KW, Wo * Cout), lambda n: (0, 0)),
            ],
            out_specs=pl.BlockSpec((Bn, Ho, Wo * Cout), lambda n: (n, 0, 0)),
            scratch_shapes=[pltpu.VMEM((Bn, Hp, Wp * Cin), jnp.float32)],
            compiler_params=pltpu.CompilerParams(
                dimension_semantics=("parallel",),
                vmem_limit_bytes=int(min(64 << 20, max(32 << 20, 2 * est)))),
        )(x, scale, shift, w)
        out = out.reshape(N, Ho, Wo, Cout)

    elif groups == 1:
        # --- NHWC layout, im2col + single bf16 MXU matmul --------------------
        x = jnp.transpose(x_nchw, (0, 2, 3, 1))
        scale = bn_scale.reshape(1, Cin)
        shift = bn_shift.reshape(1, Cin)
        K = KH * KW * Cin
        # (Cout, Cin, KH, KW) -> (KH, KW, Cin, Cout) -> (K, Cout), bf16 for the MXU
        w = jnp.transpose(conv_weight, (2, 3, 1, 0)).reshape(K, Cout).astype(jnp.bfloat16)

        per_img = 4 * (2 * H * W * Cin + 2 * Ho * Wo * Cout + Hp * Wp * Cin
                       + Ho * Wo * K + H * W * Cin + Ho * Wo * Cout)
        Bn = _pick_bn(N, per_img, budget)
        est = Bn * per_img

        kernel = _make_dense_kernel(Bn=Bn, H=H, W=W, Cin=Cin, Cout=Cout, KH=KH, KW=KW,
                                    ph=ph, pw=pw, dh=dh, dw=dw, Ho=Ho, Wo=Wo)
        out = pl.pallas_call(
            kernel,
            out_shape=jax.ShapeDtypeStruct((N, Ho, Wo, Cout), out_dtype),
            grid=(N // Bn,),
            in_specs=[
                pl.BlockSpec((Bn, H, W, Cin), lambda n: (n, 0, 0, 0)),
                pl.BlockSpec((1, Cin), lambda n: (0, 0)),
                pl.BlockSpec((1, Cin), lambda n: (0, 0)),
                pl.BlockSpec((K, Cout), lambda n: (0, 0)),
            ],
            out_specs=pl.BlockSpec((Bn, Ho, Wo, Cout), lambda n: (n, 0, 0, 0)),
            scratch_shapes=[pltpu.VMEM((Bn, Hp, Wp, Cin), jnp.float32),
                            pltpu.VMEM((Bn, Ho, Wo, K), jnp.float32)],
            compiler_params=pltpu.CompilerParams(
                dimension_semantics=("parallel",),
                vmem_limit_bytes=int(min(64 << 20, max(32 << 20, 2 * est)))),
        )(x, scale, shift, w)
    else:
        raise NotImplementedError("groups must be 1 or == channels")  # TODO(synk)

    return jnp.transpose(out, (0, 3, 1, 2))  # back to NCHW


def bn_activ_conv_reference(x_nchw, conv_weight, bn_weight, bn_bias, bn_mean, bn_var, *,
                            kernel_size, stride=(1, 1), dilation=(1, 1), groups=1,
                            eps=1e-5):
    """Pure-JAX reference mirroring the PyTorch forward (eval-mode BN)."""
    KH, KW = kernel_size
    sh, sw = stride
    dh, dw = dilation
    ph = int((dh * (KH - 1) - sh + 1) / 2)
    pw = int((dw * (KW - 1) - sw + 1) / 2)
    scale = (bn_weight / jnp.sqrt(bn_var + eps)).reshape(1, -1, 1, 1)
    shift = (bn_bias - bn_mean * bn_weight / jnp.sqrt(bn_var + eps)).reshape(1, -1, 1, 1)
    y = _gelu_tanh(x_nchw.astype(jnp.float32) * scale + shift)
    out = jax.lax.conv_general_dilated(
        y, conv_weight.astype(jnp.float32),
        window_strides=(sh, sw), padding=[(ph, ph), (pw, pw)],
        rhs_dilation=(dh, dw),
        dimension_numbers=("NCHW", "OIHW", "NCHW"),
        feature_group_count=groups)
    return out.astype(x_nchw.dtype)


if __name__ == "__main__":
    key = jax.random.PRNGKey(0)
    keys = jax.random.split(key, 12)

    # --- depthwise 3x3 (the strip_mlp configuration: groups == channels) ----
    N, C, H, W = 2, 16, 16, 16
    ks = (3, 3)
    x = jax.random.normal(keys[0], (N, C, H, W), dtype=jnp.float32)
    conv_w = 0.2 * jax.random.normal(keys[1], (C, 1, ks[0], ks[1]), dtype=jnp.float32)
    bn_w = 1.0 + 0.1 * jax.random.normal(keys[2], (C,), dtype=jnp.float32)
    bn_b = 0.1 * jax.random.normal(keys[3], (C,), dtype=jnp.float32)
    bn_m = 0.1 * jax.random.normal(keys[4], (C,), dtype=jnp.float32)
    bn_v = 1.0 + 0.1 * jnp.abs(jax.random.normal(keys[5], (C,), dtype=jnp.float32))

    out = bn_activ_conv(x, conv_w, bn_w, bn_b, bn_m, bn_v, kernel_size=ks, groups=C)
    out = jax.block_until_ready(out)
    ref = bn_activ_conv_reference(x, conv_w, bn_w, bn_b, bn_m, bn_v,
                                  kernel_size=ks, groups=C)
    assert out.shape == ref.shape and out.dtype == ref.dtype
    err = float(jnp.max(jnp.abs(out - ref)))
    assert err < 5e-4, f"depthwise mismatch vs reference: {err}"

    # --- dense 3x3 (groups == 1): im2col + bf16 MXU path ---------------------
    C2 = 8
    x2 = jax.random.normal(keys[6], (N, C2, H, W), dtype=jnp.float32)
    conv_w2 = 0.2 * jax.random.normal(keys[7], (C2, C2, ks[0], ks[1]), dtype=jnp.float32)
    bn_w2 = 1.0 + 0.1 * jax.random.normal(keys[8], (C2,), dtype=jnp.float32)
    bn_b2 = 0.1 * jax.random.normal(keys[9], (C2,), dtype=jnp.float32)
    bn_m2 = 0.1 * jax.random.normal(keys[10], (C2,), dtype=jnp.float32)
    bn_v2 = 1.0 + 0.1 * jnp.abs(jax.random.normal(keys[11], (C2,), dtype=jnp.float32))

    out2 = bn_activ_conv(x2, conv_w2, bn_w2, bn_b2, bn_m2, bn_v2,
                         kernel_size=ks, groups=1)
    out2 = jax.block_until_ready(out2)
    ref2 = bn_activ_conv_reference(x2, conv_w2, bn_w2, bn_b2, bn_m2, bn_v2,
                                   kernel_size=ks, groups=1)
    assert out2.shape == ref2.shape and out2.dtype == ref2.dtype
    err2 = float(jnp.max(jnp.abs(out2 - ref2)))
    assert err2 < 5e-2, f"dense (bf16 MXU) mismatch vs reference: {err2}"

    print("KERNEL_OK")
</pallas_src>

<mosaic_0001>
module attributes {stable_mosaic.version = 11 : i64} {
  func.func @kernel(%arg0: i32, %arg1: memref<1x16x256xf32, #tpu.memory_space<vmem>>, %arg2: memref<1x256xf32, #tpu.memory_space<vmem>>, %arg3: memref<1x256xf32, #tpu.memory_space<vmem>>, %arg4: memref<9x256xf32, #tpu.memory_space<vmem>>, %arg5: memref<1x16x256xf32, #tpu.memory_space<vmem>>, %arg6: memref<1x18x288xf32, #tpu.memory_space<vmem>>) attributes {dimension_semantics = [#tpu.dimension_semantics<parallel>], iteration_bounds = array<i64: 2>, scalar_prefetch = 0 : i64, scratch_operands = 1 : i64, tpu.core_type = #tpu.core_type<tc>, window_params = [{transform_indices = @transform_0, window_bounds = array<i64: 1, 16, 256>}, {pipeline_mode = #tpu.pipeline_mode<synchronous>, transform_indices = @transform_1, window_bounds = array<i64: 1, 256>}, {pipeline_mode = #tpu.pipeline_mode<synchronous>, transform_indices = @transform_2, window_bounds = array<i64: 1, 256>}, {pipeline_mode = #tpu.pipeline_mode<synchronous>, transform_indices = @transform_3, window_bounds = array<i64: 9, 256>}, {transform_indices = @transform_4, window_bounds = array<i64: 1, 16, 256>}]} {
    %c0 = arith.constant 0 : index
    %c0_0 = arith.constant 0 : index
    %c0_1 = arith.constant 0 : index
    %0 = vector.load %arg1[%c0, %c0_0, %c0_1] : memref<1x16x256xf32, #tpu.memory_space<vmem>>, vector<1x16x256xf32>
    %c0_2 = arith.constant 0 : index
    %c0_3 = arith.constant 0 : index
    %1 = vector.load %arg2[%c0_2, %c0_3] : memref<1x256xf32, #tpu.memory_space<vmem>>, vector<1x256xf32>
    %2 = vector.shape_cast %1 : vector<1x256xf32> to vector<1x1x256xf32>
    %c0_4 = arith.constant 0 : index
    %c0_5 = arith.constant 0 : index
    %3 = vector.load %arg3[%c0_4, %c0_5] : memref<1x256xf32, #tpu.memory_space<vmem>>, vector<1x256xf32>
    %4 = vector.shape_cast %3 : vector<1x256xf32> to vector<1x1x256xf32>
    %5 = vector.broadcast %2 : vector<1x1x256xf32> to vector<1x16x256xf32>
    %6 = arith.mulf %0, %5 : vector<1x16x256xf32>
    %7 = vector.broadcast %4 : vector<1x1x256xf32> to vector<1x16x256xf32>
    %8 = arith.addf %6, %7 : vector<1x16x256xf32>
    %cst = arith.constant 5.000000e-01 : f32
    %9 = vector.broadcast %cst : f32 to vector<1x16x256xf32>
    %10 = arith.mulf %9, %8 : vector<1x16x256xf32>
    %cst_6 = arith.constant 4.471500e-02 : f32
    %11 = vector.broadcast %cst_6 : f32 to vector<1x16x256xf32>
    %12 = arith.mulf %11, %8 : vector<1x16x256xf32>
    %13 = arith.mulf %12, %8 : vector<1x16x256xf32>
    %14 = arith.mulf %13, %8 : vector<1x16x256xf32>
    %15 = arith.addf %8, %14 : vector<1x16x256xf32>
    %cst_7 = arith.constant 0.797884583 : f32
    %16 = vector.broadcast %cst_7 : f32 to vector<1x16x256xf32>
    %17 = arith.mulf %16, %15 : vector<1x16x256xf32>
    %18 = math.tanh %17 : vector<1x16x256xf32>
    %cst_8 = arith.constant 1.000000e+00 : f32
    %19 = vector.broadcast %cst_8 : f32 to vector<1x16x256xf32>
    %20 = arith.addf %19, %18 : vector<1x16x256xf32>
    %21 = arith.mulf %10, %20 : vector<1x16x256xf32>
    %cst_9 = arith.constant 0.000000e+00 : f32
    %22 = vector.broadcast %cst_9 : f32 to vector<1x1x288xf32>
    %c0_10 = arith.constant 0 : index
    %c0_11 = arith.constant 0 : index
    %c0_12 = arith.constant 0 : index
    %23 = vector.load %arg6[%c0_10, %c0_11, %c0_12] : memref<1x18x288xf32, #tpu.memory_space<vmem>>, vector<1x1x288xf32>
    tpu.vector_store %arg6[%c0_10, %c0_11, %c0_12], %22 {strides = array<i32>} : memref<1x18x288xf32, #tpu.memory_space<vmem>>, vector<1x1x288xf32>,
    %cst_13 = arith.constant 0.000000e+00 : f32
    %24 = vector.broadcast %cst_13 : f32 to vector<1x1x288xf32>
    %c0_14 = arith.constant 0 : index
    %c17 = arith.constant 17 : index
    %c0_15 = arith.constant 0 : index
    %25 = vector.load %arg6[%c0_14, %c17, %c0_15] : memref<1x18x288xf32, #tpu.memory_space<vmem>>, vector<1x1x288xf32>
    tpu.vector_store %arg6[%c0_14, %c17, %c0_15], %24 {strides = array<i32>} : memref<1x18x288xf32, #tpu.memory_space<vmem>>, vector<1x1x288xf32>,
    %cst_16 = arith.constant 0.000000e+00 : f32
    %26 = vector.broadcast %cst_16 : f32 to vector<1x16x16xf32>
    %c0_17 = arith.constant 0 : index
    %c1 = arith.constant 1 : index
    %c0_18 = arith.constant 0 : index
    %27 = vector.load %arg6[%c0_17, %c1, %c0_18] : memref<1x18x288xf32, #tpu.memory_space<vmem>>, vector<1x16x16xf32>
    tpu.vector_store %arg6[%c0_17, %c1, %c0_18], %26 {strides = array<i32>} : memref<1x18x288xf32, #tpu.memory_space<vmem>>, vector<1x16x16xf32>,
    %cst_19 = arith.constant 0.000000e+00 : f32
    %28 = vector.broadcast %cst_19 : f32 to vector<1x16x16xf32>
    %c0_20 = arith.constant 0 : index
    %c1_21 = arith.constant 1 : index
    %c272 = arith.constant 272 : index
    %29 = vector.load %arg6[%c0_20, %c1_21, %c272] : memref<1x18x288xf32, #tpu.memory_space<vmem>>, vector<1x16x16xf32>
    tpu.vector_store %arg6[%c0_20, %c1_21, %c272], %28 {strides = array<i32>} : memref<1x18x288xf32, #tpu.memory_space<vmem>>, vector<1x16x16xf32>,
    %c0_22 = arith.constant 0 : index
    %c1_23 = arith.constant 1 : index
    %c16 = arith.constant 16 : index
    %30 = vector.load %arg6[%c0_22, %c1_23, %c16] : memref<1x18x288xf32, #tpu.memory_space<vmem>>, vector<1x16x256xf32>
    tpu.vector_store %arg6[%c0_22, %c1_23, %c16], %21 {strides = array<i32>} : memref<1x18x288xf32, #tpu.memory_space<vmem>>, vector<1x16x256xf32>,
    %c0_24 = arith.constant 0 : index
    %c0_25 = arith.constant 0 : index
    %31 = vector.load %arg4[%c0_24, %c0_25] : memref<9x256xf32, #tpu.memory_space<vmem>>, vector<9x256xf32>
    %32 = vector.extract_strided_slice %31 {offsets = [0, 0], sizes = [1, 256], strides = [1, 1]} : vector<9x256xf32> to vector<1x256xf32>
    %33 = vector.shape_cast %32 : vector<1x256xf32> to vector<256xf32>
    %34 = vector.shape_cast %33 : vector<256xf32> to vector<1x1x256xf32>
    %35 = vector.extract_strided_slice %31 {offsets = [1, 0], sizes = [1, 256], strides = [1, 1]} : vector<9x256xf32> to vector<1x256xf32>
    %36 = vector.shape_cast %35 : vector<1x256xf32> to vector<256xf32>
    %37 = vector.shape_cast %36 : vector<256xf32> to vector<1x1x256xf32>
    %38 = vector.extract_strided_slice %31 {offsets = [2, 0], sizes = [1, 256], strides = [1, 1]} : vector<9x256xf32> to vector<1x256xf32>
    %39 = vector.shape_cast %38 : vector<1x256xf32> to vector<256xf32>
    %40 = vector.shape_cast %39 : vector<256xf32> to vector<1x1x256xf32>
    %41 = vector.extract_strided_slice %31 {offsets = [3, 0], sizes = [1, 256], strides = [1, 1]} : vector<9x256xf32> to vector<1x256xf32>
    %42 = vector.shape_cast %41 : vector<1x256xf32> to vector<256xf32>
    %43 = vector.shape_cast %42 : vector<256xf32> to vector<1x1x256xf32>
    %44 = vector.extract_strided_slice %31 {offsets = [4, 0], sizes = [1, 256], strides = [1, 1]} : vector<9x256xf32> to vector<1x256xf32>
    %45 = vector.shape_cast %44 : vector<1x256xf32> to vector<256xf32>
    %46 = vector.shape_cast %45 : vector<256xf32> to vector<1x1x256xf32>
    %47 = vector.extract_strided_slice %31 {offsets = [5, 0], sizes = [1, 256], strides = [1, 1]} : vector<9x256xf32> to vector<1x256xf32>
    %48 = vector.shape_cast %47 : vector<1x256xf32> to vector<256xf32>
    %49 = vector.shape_cast %48 : vector<256xf32> to vector<1x1x256xf32>
    %50 = vector.extract_strided_slice %31 {offsets = [6, 0], sizes = [1, 256], strides = [1, 1]} : vector<9x256xf32> to vector<1x256xf32>
    %51 = vector.shape_cast %50 : vector<1x256xf32> to vector<256xf32>
    %52 = vector.shape_cast %51 : vector<256xf32> to vector<1x1x256xf32>
    %53 = vector.extract_strided_slice %31 {offsets = [7, 0], sizes = [1, 256], strides = [1, 1]} : vector<9x256xf32> to vector<1x256xf32>
    %54 = vector.shape_cast %53 : vector<1x256xf32> to vector<256xf32>
    %55 = vector.shape_cast %54 : vector<256xf32> to vector<1x1x256xf32>
    %56 = vector.extract_strided_slice %31 {offsets = [8, 0], sizes = [1, 256], strides = [1, 1]} : vector<9x256xf32> to vector<1x256xf32>
    %57 = vector.shape_cast %56 : vector<1x256xf32> to vector<256xf32>
    %58 = vector.shape_cast %57 : vector<256xf32> to vector<1x1x256xf32>
    %cst_26 = arith.constant 0.000000e+00 : f32
    %59 = vector.broadcast %cst_26 : f32 to vector<1x16x256xf32>
    %c0_27 = arith.constant 0 : index
    %c0_28 = arith.constant 0 : index
    %c0_29 = arith.constant 0 : index
    %60 = vector.load %arg6[%c0_27, %c0_28, %c0_29] : memref<1x18x288xf32, #tpu.memory_space<vmem>>, vector<1x16x256xf32>
    %61 = vector.broadcast %34 : vector<1x1x256xf32> to vector<1x16x256xf32>
    %62 = arith.mulf %60, %61 : vector<1x16x256xf32>
    %63 = arith.addf %59, %62 : vector<1x16x256xf32>
    %c0_30 = arith.constant 0 : index
    %c0_31 = arith.constant 0 : index
    %c16_32 = arith.constant 16 : index
    %64 = vector.load %arg6[%c0_30, %c0_31, %c16_32] : memref<1x18x288xf32, #tpu.memory_space<vmem>>, vector<1x16x256xf32>
    %65 = vector.broadcast %37 : vector<1x1x256xf32> to vector<1x16x256xf32>
    %66 = arith.mulf %64, %65 : vector<1x16x256xf32>
    %67 = arith.addf %63, %66 : vector<1x16x256xf32>
    %c0_33 = arith.constant 0 : index
    %c0_34 = arith.constant 0 : index
    %c32 = arith.constant 32 : index
    %68 = vector.load %arg6[%c0_33, %c0_34, %c32] : memref<1x18x288xf32, #tpu.memory_space<vmem>>, vector<1x16x256xf32>
    %69 = vector.broadcast %40 : vector<1x1x256xf32> to vector<1x16x256xf32>
    %70 = arith.mulf %68, %69 : vector<1x16x256xf32>
    %71 = arith.addf %67, %70 : vector<1x16x256xf32>
    %c0_35 = arith.constant 0 : index
    %c1_36 = arith.constant 1 : index
    %c0_37 = arith.constant 0 : index
    %72 = vector.load %arg6[%c0_35, %c1_36, %c0_37] : memref<1x18x288xf32, #tpu.memory_space<vmem>>, vector<1x16x256xf32>
    %73 = vector.broadcast %43 : vector<1x1x256xf32> to vector<1x16x256xf32>
    %74 = arith.mulf %72, %73 : vector<1x16x256xf32>
    %75 = arith.addf %71, %74 : vector<1x16x256xf32>
    %c0_38 = arith.constant 0 : index
    %c1_39 = arith.constant 1 : index
    %c16_40 = arith.constant 16 : index
    %76 = vector.load %arg6[%c0_38, %c1_39, %c16_40] : memref<1x18x288xf32, #tpu.memory_space<vmem>>, vector<1x16x256xf32>
    %77 = vector.broadcast %46 : vector<1x1x256xf32> to vector<1x16x256xf32>
    %78 = arith.mulf %76, %77 : vector<1x16x256xf32>
    %79 = arith.addf %75, %78 : vector<1x16x256xf32>
    %c0_41 = arith.constant 0 : index
    %c1_42 = arith.constant 1 : index
    %c32_43 = arith.constant 32 : index
    %80 = vector.load %arg6[%c0_41, %c1_42, %c32_43] : memref<1x18x288xf32, #tpu.memory_space<vmem>>, vector<1x16x256xf32>
    %81 = vector.broadcast %49 : vector<1x1x256xf32> to vector<1x16x256xf32>
    %82 = arith.mulf %80, %81 : vector<1x16x256xf32>
    %83 = arith.addf %79, %82 : vector<1x16x256xf32>
    %c0_44 = arith.constant 0 : index
    %c2 = arith.constant 2 : index
    %c0_45 = arith.constant 0 : index
    %84 = vector.load %arg6[%c0_44, %c2, %c0_45] : memref<1x18x288xf32, #tpu.memory_space<vmem>>, vector<1x16x256xf32>
    %85 = vector.broadcast %52 : vector<1x1x256xf32> to vector<1x16x256xf32>
    %86 = arith.mulf %84, %85 : vector<1x16x256xf32>
    %87 = arith.addf %83, %86 : vector<1x16x256xf32>
    %c0_46 = arith.constant 0 : index
    %c2_47 = arith.constant 2 : index
    %c16_48 = arith.constant 16 : index
    %88 = vector.load %arg6[%c0_46, %c2_47, %c16_48] : memref<1x18x288xf32, #tpu.memory_space<vmem>>, vector<1x16x256xf32>
    %89 = vector.broadcast %55 : vector<1x1x256xf32> to vector<1x16x256xf32>
    %90 = arith.mulf %88, %89 : vector<1x16x256xf32>
    %91 = arith.addf %87, %90 : vector<1x16x256xf32>
    %c0_49 = arith.constant 0 : index
    %c2_50 = arith.constant 2 : index
    %c32_51 = arith.constant 32 : index
    %92 = vector.load %arg6[%c0_49, %c2_50, %c32_51] : memref<1x18x288xf32, #tpu.memory_space<vmem>>, vector<1x16x256xf32>
    %93 = vector.broadcast %58 : vector<1x1x256xf32> to vector<1x16x256xf32>
    %94 = arith.mulf %92, %93 : vector<1x16x256xf32>
    %95 = arith.addf %91, %94 : vector<1x16x256xf32>
    %c0_52 = arith.constant 0 : index
    %c0_53 = arith.constant 0 : index
    %c0_54 = arith.constant 0 : index
    %96 = vector.load %arg5[%c0_52, %c0_53, %c0_54] : memref<1x16x256xf32, #tpu.memory_space<vmem>>, vector<1x16x256xf32>
    tpu.vector_store %arg5[%c0_52, %c0_53, %c0_54], %95 {strides = array<i32>} : memref<1x16x256xf32, #tpu.memory_space<vmem>>, vector<1x16x256xf32>,
    return
  }
  func.func @transform_0(%arg0: i32) -> (i32, i32, i32) {
    %c0_i32 = arith.constant 0 : i32
    %c0_i32_0 = arith.constant 0 : i32
    %c0_i32_1 = arith.constant 0 : i32
    return %arg0, %c0_i32, %c0_i32_0 : i32, i32, i32
  }
  func.func @transform_1(%arg0: i32) -> (i32, i32) {
    %c0_i32 = arith.constant 0 : i32
    %c0_i32_0 = arith.constant 0 : i32
    %c0_i32_1 = arith.constant 0 : i32
    return %c0_i32, %c0_i32_0 : i32, i32
  }
  func.func @transform_2(%arg0: i32) -> (i32, i32) {
    %c0_i32 = arith.constant 0 : i32
    %c0_i32_0 = arith.constant 0 : i32
    %c0_i32_1 = arith.constant 0 : i32
    return %c0_i32, %c0_i32_0 : i32, i32
  }
  func.func @transform_3(%arg0: i32) -> (i32, i32) {
    %c0_i32 = arith.constant 0 : i32
    %c0_i32_0 = arith.constant 0 : i32
    %c0_i32_1 = arith.constant 0 : i32
    return %c0_i32, %c0_i32_0 : i32, i32
  }
  func.func @transform_4(%arg0: i32) -> (i32, i32, i32) {
    %c0_i32 = arith.constant 0 : i32
    %c0_i32_0 = arith.constant 0 : i32
    %c0_i32_1 = arith.constant 0 : i32
    return %arg0, %c0_i32, %c0_i32_0 : i32, i32, i32
  }
}

</mosaic_0001>

<bundles_post_ra>
// kernel: tpu_custom_call.1
= control target key start
LH: loop header
LB: loop body
LE: loop exit
PB: predicated region body
PF: predicated region fallthrough
CT: control target
= control target key end

     0   :  { %9 = vsyncpa [#allocation4], 0  ;;  %s1866_s0 = inlined_call_operand.hbm [shape: f32[2,16,256], index: 0, kind: input, shape index: {}]   ;;  %s1867_s1 = inlined_call_operand.vmem [shape: f32[1,256], index: 1, kind: input, shape index: {}]   ;;  %s1868_s2 = inlined_call_operand.vmem [shape: f32[1,256], index: 2, kind: input, shape index: {}]   ;;  %s1869_s3 = inlined_call_operand.hbm [shape: f32[9,256], index: 3, kind: input, shape index: {}]   ;;  %s1870_s4 = inlined_call_operand.hbm [shape: f32[2,16,256], index: 4, kind: output, shape index: {}]  }
   0x1   :  { %11 = vsyncpa [#allocation4 + $0x1], 0 }
   0x2   :  { %12 = vsyncpa [#allocation7], 0 }
   0x3   :  { %13 = vsyncpa [#allocation5], 0 }
   0x4   :  { %15 = vsyncpa [#allocation5 + $0x1], 0  ;;  %s1258_s15 = smov 0   ;;  %s1260_s16 = smov 0  }
   0x5   :  { %s1262_s17 = smov 0   ;;  %s1264_s18 = smov 0  }
   0x6 LB: > { %s1279_s19 = sadd.s32 4294967295, %s1220_s18   ;;  %s999_s20 = sadd.s32 4294967294, %s1220_s18   ;;  %s1220_s18 = sphi %s1264_s18, %s1890_s18   ;;  %s1216_s17 = sphi %s1262_s17, %s1889_s17   ;;  %s1212_s16 = sphi %s1260_s16, %s1888_s16   ;;  %s1208_s15 = sphi %s1258_s15, %s1887_s15  }
   0x7   : > { %p41_p0 = scmp.ne.s32.totalorder %s1212_s16, %s1208_s15  ;;  %p1871_p1 = scmp.eq.s32.totalorder %s1279_s19, 0 }
   0x8   : > { %p134_p3 = scmp.eq.s32.totalorder %s999_s20, 1  ;;  %p1000_p5 = scmp.ge.s32.totalorder %s1220_s18, 1 }
   0x9   : > { %p1288_p4 = por %p1871_p1, %p41_p0  ;;  %p141_p7 = scmp.lt.s32.totalorder %s1220_s18, 3 }
   0xa   : > { %p1293_p6 = por %p134_p3, %p41_p0  ;;  %s1222_s24 = smov [#allocation6]  }
   0xb   : > { %s1874_s21 = scalar_select %p1288_p4, 1, 0 }
   0xc   : > { %s1875_s22 = scalar_select %p1293_p6, 1, 0 }
   0xd   : > { %p1298_p8 = pnand %p1000_p5, %p141_p7  ;;  %s159_s25 = sshll.u32 %s1222_s24, 4  ;;  %s1302_s25 = int_to_ptr.vmem [resolvable:$true] %s159_s25 }
   0xe   : > { %s1314_s27 = sadd.s32 1, %s1220_s18   ;;  %s28_s28 = sadd.s32 1, %s1216_s17 }
   0xf   : > { %s1876_s23 = scalar_select %p1298_p8, 1, 0 }
  0x10   : > { %p1027_p9 = pneg %p1298_p8  ;;  %s25_s29 = ssub.s32 %s1220_s18, %s1314_s27 }
  0x11   : > { %s1092_s6 = scalar_lea.hbm %s1869_s3, 512 }
  0x12   : > { %p1309_p11 = pnand %p1027_p9, %p1871_p1  ;;  %p1093_p12 = scmp.ne.s32.totalorder %s1869_s3, %s1092_s6 }
  0x13   : > { %p1099_p5 = scmp.lt.u32.totalorder %s1092_s6, %s1869_s3 }
  0x14   : > { %p1094_p13 = pneg %p1309_p11 }
  0x16   : > { %p1095_p0 = pnand %p1094_p13, %p1093_p12 }
  0x18   : > { %p1096_p3 = pneg %p1095_p0 }
  0x1a   : > { %p1101_p7 = pnand %p1099_p5, %p1096_p3 }
  0x1c   : > { %1104 = shalt.err (!%p1101_p7)
}
  0x1d   : > { %s1105_s11 = scalar_lea.vmem %s1302_s25, 512  ;;  %p1113_p2 = scmp.lt.s32.totalorder %s1302_s25, %s1302_s25 }
  0x1e   : > { %p1106_p9 = scmp.ne.s32.totalorder %s1302_s25, %s1105_s11  ;;  %p1114_p6 = scmp.lt.s32.totalorder %s1105_s11, %s1105_s11 }
  0x20   : > { %p1108_p10 = pnand %p1106_p9, %p1094_p13  ;;  %p1115_p4 = por %p1114_p6, %p1113_p2 }
  0x22   : > { %p1109_p1 = pneg %p1108_p10 }
  0x24   : > { %p1116_p8 = pnand %p1115_p4, %p1109_p1 }
  0x26   : > { %1119 = shalt.err (!%p1116_p8)
}
  0x27   : > { %s1223_s12 = smov 256   ;;  %s1224_s13 = smov 16  }
  0x28   : > { %1030 = dma.hbm_to_vmem [thread:$0]  (!%p1309_p11), %s1869_s3, 512, %s1302_s25, [#allocation7], %s1223_s12, %s1223_s12, %s1224_s13  }
  0x29   : > { %p26_p1 = scmp.eq.s32.totalorder %s25_s29, 0  ;;  %p35_p2 = scmp.ne.s32.totalorder %s1216_s17, %s1212_s16 }
  0x2a   : > { %p36_p4 = scmp.eq.s32.totalorder %s1220_s18, 0  ;;  %p1040_p6 = scmp.lt.s32.totalorder %s1220_s18, 2 }
  0x2b   : > { %s1348_s24 = scalar_select %p26_p1, %s1216_s17, %s28_s28  }
  0x2c   : > { %p37_p8 = por %p36_p4, %p35_p2  ;;  %p1878_p10 = scmp.eq.s32.totalorder %s1279_s19, 1 }
  0x2d   : > { %s173_s26 = sand.u32 1, %s1216_s17   ;;  %s1017_s5 = sshll.u32 %s1220_s18, 9 }
  0x2e   : > { %p1352_p12 = por %p1878_p10, %p35_p2  ;;  %s1003_s6 = sshll.u32 %s173_s26, 5 }
  0x2f   : > { %s1361_s9 = scalar_lea.hbm %s1866_s0, %s1017_s5  ;;  %s177_s25 = scalar_lea.vmem [#allocation3], %s1003_s6 }
  0x30   : > { %s184_s28 = sshll.u32 %s177_s25, 4  ;;  %p1363_p11 = pnand %p1040_p6, %p37_p8  ;;  %s1367_s28 = int_to_ptr.vmem [resolvable:$true] %s184_s28 }
  0x31   : > { %s1369_s10 = scalar_lea.sflag [#allocation4], %s173_s26  ;;  %s1120_s11 = scalar_lea.hbm %s1361_s9, 512 }
  0x32   : > { %p1121_p13 = scmp.ne.s32.totalorder %s1361_s9, %s1120_s11  ;;  %p1122_p0 = pneg %p1363_p11 }
  0x33   : > { %s1125_s5 = scalar_lea.hbm %s1866_s0, 1024  ;;  %p1126_p7 = scmp.lt.u32.totalorder %s1361_s9, %s1866_s0 }
  0x34   : > { %p1123_p3 = pnand %p1122_p0, %p1121_p13  ;;  %p1127_p9 = scmp.lt.u32.totalorder %s1125_s5, %s1120_s11 }
  0x35   : > { %p1129_p2 = scmp.lt.u32.totalorder %s1120_s11, %s1361_s9 }
  0x36   : > { %p1124_p5 = pneg %p1123_p3  ;;  %p1128_p1 = por %p1127_p9, %p1126_p7 }
  0x38   : > { %p1130_p4 = por %p1129_p2, %p1128_p1 }
  0x3a   : > { %p1131_p6 = pnand %p1130_p4, %p1124_p5 }
  0x3c   : > { %1134 = shalt.err (!%p1131_p6)
}
  0x3d   : > { %s1135_s26 = scalar_lea.vmem %s1367_s28, 512  ;;  %s1225_s8 = smov [#allocation3]  }
  0x3e   : > { %p1136_p8 = scmp.ne.s32.totalorder %s1367_s28, %s1135_s26  ;;  %s1140_s25 = sshll.u32 %s1225_s8, 4  ;;  %s1141_s25 = int_to_ptr.vmem [resolvable:$false] %s1140_s25 }
  0x3f   : > { %s1142_s14 = scalar_lea.vmem %s1141_s25, 1024  ;;  %p1143_p3 = scmp.lt.s32.totalorder %s1367_s28, %s1141_s25 }
  0x40   : > { %p1138_p10 = pnand %p1136_p8, %p1122_p0  ;;  %p1144_p7 = scmp.lt.s32.totalorder %s1142_s14, %s1135_s26 }
  0x42   : > { %p1139_p13 = pneg %p1138_p10  ;;  %p1145_p9 = por %p1144_p7, %p1143_p3 }
  0x44   : > { %p1146_p1 = pnand %p1145_p9, %p1139_p13 }
  0x46   : > { %1149 = shalt.err (!%p1146_p1)
}
  0x47   : > { %1034 = dma.hbm_to_vmem [thread:$0]  (!%p1363_p11), %s1361_s9, 512, %s1367_s28, %s1369_s10, %s1223_s12, %s1223_s12, %s1224_s13  }
  0x48   : > { %p1881_p0 = scmp.ne.s32.totalorder %s1876_s23, 0 }
  0x49   : > { %s1403_s11 = sand.u32 (!%p1881_p0), 1, %s1212_s16   ;;  %p1882_p5 = scmp.ne.s32.totalorder (!%p1881_p0), %s1874_s21, 0 }
  0x4a   : > { %196 = sbr.rel (%p1881_p0) target bundleno = 456 (0x1c8), region = 36  ;;  %s1007_s20 = sshll.u32 (!%p1881_p0), %s1403_s11, 5 }
  0x4b   : > { %s199_s5 = scalar_lea.sflag (!%p1881_p0), [#allocation4], %s1403_s11  ;;  %s202_s29 = scalar_lea.vmem (!%p1881_p0), [#allocation3], %s1007_s20 }
  0x51   : > { %1195 = dma.done.wait (%p1882_p5), %s199_s5, 512  }
  0x52   : > { %1197 = vsyncadd (%p1882_p5), %s199_s5, 4294966784  ;;  %p1883_p11 = scmp.eq.s32.totalorder %s1279_s19, 0 }
  0x54   : > { %1199 = dma.done.wait (%p1883_p11), [#allocation7], 512   ;;  %p1884_p2 = pmov %p1883_p11 }
  0x55   : > { %v238_v0 = vlaneseq  ;;  %v1424_v5 = vld [vmem:[#allocation6 + $0x8] sm:$0xff]  ;;  %v233_v7 = vld [vmem:[%s202_s29 + $0x10] sm:$0xff]  ;;  %v234_v9 = vld [vmem:[%s202_s29 + $0x18] sm:$0xff]  ;;  %s1226_s9 = smov 16   ;;  %vm314_vm0 = vcmask 130048   ;;  %v1227_v30 = vmov 0.0  }
  0x56   : > { %1201 = vsyncadd (%p1884_p2), [#allocation7], 4294966784  ;;  %v232_v6 = vld [vmem:[%s202_s29 + $0x8] sm:$0xff]  ;;  %v235_v10 = vld [vmem:[%s1867_s1] sm:$0x3]  ;;  %315 = vst.msk [vmem:[#allocation2 + $0x18] sm:$0xff] %vm314_vm0, %v1227_v30 }
  0x57   : > { %v1417_v1 = vshrl.u32 %v238_v0, 7  ;;  %v236_v11 = vld [vmem:[%s1868_s2] sm:$0x3]  ;;  %v1435_v16 = vld [vmem:[#allocation6] sm:$0xff]  ;;  %vm305_vm1 = vcmp.lt.s32.totalorder %v238_v0, 288  ;;  %s1228_s28 = smov 32  }
  0x58   : > { %v231_v17 = vld [vmem:[%s202_s29] sm:$0xff]  ;;  %310 = vst.msk [vmem:[#allocation2 + $0x31] ss:$8 sm:$0x7] %vm305_vm1, %v1227_v30  ;;  %vm316_vm2 = vcmask 122880   ;;  %vm322_vm3 = vcmask 254080  }
  0x59   : > { %v1420_v2 = vsub.s32 0, %v1417_v1  ;;  %v244_v3 = vsub.s32 1, %v1417_v1  ;;  %v454_v4 = vsub.s32 2, %v1417_v1  ;;  %v555_v20 = vsub.s32 4, %v1417_v1  ;;  %323 = vst.msk [vmem:[#allocation2 + $0x40] sm:$0x1] %vm322_vm3, %v1227_v30 }
  0x5a   : > { %307 = vst.msk [vmem:[#allocation2] ss:$8 sm:$0x7] %vm305_vm1, %v1227_v30  ;;  %v630_v35 = vsub.s32 5, %v1417_v1  ;;  %vm312_vm4 = vcmask 130049   ;;  %vm318_vm5 = vcmask 261249  }
  0x5b   : > { %v404_v8 = vrot.slane %v1424_v5, %v244_v3  ;;  %v241_v12 = vrot.slane %v235_v10, %v1420_v2  ;;  %v245_v13 = vrot.slane %v235_v10, %v244_v3  ;;  %v256_v14 = vrot.slane %v236_v11, %v1420_v2  ;;  %317 = vst.msk [vmem:[#allocation2 + $0x30] sm:$0x1] %vm316_vm2, %v1227_v30  ;;  %s1229_s10 = smov 112   ;;  %s1230_s6 = smov 96  }
  0x5c   : > { %v260_v15 = vrot.slane %v236_v11, %v244_v3  ;;  %v400_v18 = vrot.slane %v1435_v16, %v244_v3  ;;  %v459_v19 = vrot.slane %v1424_v5, %v454_v4  ;;  %v455_v25 = vrot.slane %v1435_v16, %v454_v4  ;;  %313 = vst.msk [vmem:[#allocation2] sm:$0xfe] %vm312_vm4, %v1227_v30  ;;  %s230_s7 = scalar_lea.vmem [#allocation8], %s1007_s20  ;;  %s1018_s8 = sshll.u32 %s1279_s19, 9 }
  0x5d   : > { %409 = vrot.lane.b32.xlu1 %v404_v8, %s1226_s9  ;;  %v249_v21 = vmul.f32 %v245_v13, %v232_v6  ;;  %v250_v22 = vmul.f32 %v241_v12, %v233_v7  ;;  %v251_v23 = vmul.f32 %v245_v13, %v234_v9  ;;  %v248_v24 = vmul.f32 %v241_v12, %v231_v17  ;;  %s916_s26 = sshll.u32 %s230_s7, 4  ;;  %s1821_s20 = scalar_lea.hbm %s1870_s4, %s1018_s8  ;;  %s1815_s26 = int_to_ptr.vmem [resolvable:$true] %s916_s26 }
  0x5e   : > { %407 = vrot.lane.b32.xlu0 %v400_v18, %s1226_s9  ;;  %v560_v31 = vrot.slane %v1424_v5, %v555_v20  ;;  %v556_v34 = vrot.slane %v1435_v16, %v555_v20  ;;  %v631_v44 = vrot.slane %v1435_v16, %v630_v35  ;;  %319 = vst.msk [vmem:[#allocation2 + $0x10] sm:$0xfe] %vm318_vm5, %v1227_v30  ;;  %v709_v56 = vsub.s32 6, %v1417_v1  ;;  %s903_s5 = scalar_lea.sflag [#allocation5], %s1403_s11  ;;  %s1150_s19 = scalar_lea.vmem %s1815_s26, 512 }
  0x5f   : > { %v266_v26 = vadd.f32 %v260_v15, %v251_v23  ;;  %v263_v27 = vadd.f32 %v256_v14, %v248_v24  ;;  %v264_v28 = vadd.f32 %v260_v15, %v249_v21  ;;  %v265_v29 = vadd.f32 %v256_v14, %v250_v22  ;;  %p1151_p4 = scmp.ne.s32.totalorder %s1815_s26, %s1150_s19  ;;  %s1231_s29 = smov [#allocation8]  }
  0x60   : > { %vm320_vm6 = vcmask 261248   ;;  %v1459_v62 = vrot.slane %v1435_v16, %v709_v56  ;;  %vm328_vm7 = vcmask 1040384   ;;  %v635_v20 = vrot.slane %v1424_v5, %v630_v35  ;;  %s1154_s21 = sshll.u32 %s1231_s29, 4  ;;  %s1155_s21 = int_to_ptr.vmem [resolvable:$false] %s1154_s21 }
  0x61   : > { %464 = vrot.lane.b32.xlu1 %v459_v19, %s1228_s28  ;;  %v274_v32 = vmul.f32 0.044715, %v266_v26  ;;  %v271_v33 = vmul.f32 0.044715, %v263_v27  ;;  %v272_v36 = vmul.f32 0.044715, %v264_v28  ;;  %v1474_v22 = vrot.slane %v1435_v16, %v1420_v2  ;;  %p1152_p6 = pnand %p1151_p4, %p1352_p12  ;;  %p1157_p10 = scmp.lt.s32.totalorder %s1815_s26, %s1155_s21 }
  0x62   : > { %462 = vrot.lane.b32.xlu0 %v455_v25, %s1228_s28  ;;  %v273_v37 = vmul.f32 0.044715, %v265_v29  ;;  %v270_v55 = vmul.f32 0.5, %v266_v26  ;;  %v267_v58 = vmul.f32 0.5, %v263_v27  ;;  %v268_v61 = vmul.f32 0.5, %v264_v28  ;;  %321 = vst.msk [vmem:[#allocation2 + $0x28] sm:$0xff] %vm320_vm6, %v1227_v30 }
  0x63   : > { %v278_v38 = vmul.f32 %v274_v32, %v266_v26  ;;  %v275_v39 = vmul.f32 %v271_v33, %v263_v27  ;;  %v276_v40 = vmul.f32 %v272_v36, %v264_v28  ;;  %v269_v3 = vmul.f32 0.5, %v265_v29  ;;  %v1010_v25 = vld [vmem:[#allocation6 + $0x10] ss:$0 sm:$0xff]  ;;  %p1153_p8 = pneg %p1152_p6  ;;  %s1156_s23 = scalar_lea.vmem %s1155_s21, 1024 }
  0x64   : > { %v277_v41 = vmul.f32 %v273_v37, %v265_v29  ;;  %v750_v19 = vsub.s32 7, %v1417_v1  ;;  %v1481_v24 = vrot.slane %v1424_v5, %v1420_v2  ;;  %v1494_v30 = vrot.slane %v1424_v5, %v709_v56  ;;  %p1158_p13 = scmp.lt.s32.totalorder %s1156_s23, %s1150_s19 }
  0x65   : > { %565 = vrot.lane.b32.xlu1 %v560_v31, %s1226_s9  ;;  %v282_v42 = vmul.f32 %v278_v38, %v266_v26  ;;  %v279_v43 = vmul.f32 %v275_v39, %v263_v27  ;;  %v280_v45 = vmul.f32 %v276_v40, %v264_v28  ;;  %vm359_vm8 = vcmask 1047681  }
  0x66   : > { %563 = vrot.lane.b32.xlu0 %v556_v34, %s1226_s9  ;;  %v281_v46 = vmul.f32 %v277_v41, %v265_v29  ;;  %v751_v21 = vrot.slane %v1435_v16, %v750_v19  ;;  %v755_v23 = vrot.slane %v1424_v5, %v750_v19  ;;  %vm363_vm9 = vcmask 1047680   ;;  %p1159_p3 = por %p1158_p13, %p1157_p10 }
  0x67   : > { %v286_v47 = vadd.f32 %v282_v42, %v266_v26  ;;  %v283_v48 = vadd.f32 %v279_v43, %v263_v27  ;;  %v284_v49 = vadd.f32 %v280_v45, %v264_v28  ;;  %v514_v26 = vsub.s32 3, %v1417_v1  ;;  %v1011_v28 = vld [vmem:[#allocation6 + $0x18] ss:$0 sm:$0xff] }
  0x68   : > { %v285_v50 = vadd.f32 %v281_v46, %v265_v29  ;;  %vm367_vm10 = vcmask 1040512   ;;  %vm466_vm11 = vcmask 261120   ;;  %vm532_vm12 = vcmask 1046528   ;;  %p1160_p7 = pnand %p1159_p3, %p1153_p8 }
  0x69   : > { %v290_v51 = vmul.f32 0.7978846, %v286_v47  ;;  %v287_v52 = vmul.f32 0.7978846, %v283_v48  ;;  %v288_v53 = vmul.f32 0.7978846, %v284_v49  ;;  %v1486_v27 = vrot.slane %v1435_v16, %v514_v26 }
  0x6a   : > { %638 = vrot.lane.b32.xlu0 %v631_v44, %s1228_s28  ;;  %v289_v54 = vmul.f32 0.7978846, %v285_v50  ;;  %v1490_v29 = vrot.slane %v1424_v5, %v514_v26  ;;  %vm727_vm13 = vcmask 1045504   ;;  %vm439_vm14 = vcmask 916480  }
  0x6b   : > { %1084 = vtanh.f32 %v290_v51  ;;  %vm495_vm15 = vcmask 785408  }
  0x6c   : > { %1086 = vtanh.f32 %v287_v52 }
  0x6d   : > { %1088 = vtanh.f32 %v288_v53 }
  0x6e   : > { %1090 = vtanh.f32 %v289_v54 }
  0x75   : > { %v1085_v57 = vpop.eup %1084 }
  0x76   : > { %v1087_v59 = vpop.eup %1086  ;;  %v298_v60 = vadd.f32 1.0, %v1085_v57 }
  0x77   : > { %v1089_v63 = vpop.eup %1088  ;;  %v295_v0 = vadd.f32 1.0, %v1087_v59 }
  0x78   : > { %v1091_v4 = vpop.eup %1090  ;;  %v302_v6 = vmul.f32 %v298_v60, %v270_v55  ;;  %v296_v7 = vadd.f32 1.0, %v1089_v63 }
  0x79   : > { %v299_v8 = vmul.f32 %v295_v0, %v267_v58  ;;  %v297_v9 = vadd.f32 1.0, %v1091_v4 }
  0x7a   : > { %v333_v10 = vrot.slane %v302_v6, 7  ;;  %v300_v11 = vmul.f32 %v296_v7, %v268_v61 }
  0x7b   : > { %v329_v12 = vrot.slane %v299_v8, 7  ;;  %v301_v13 = vmul.f32 %v297_v9, %v269_v3 }
  0x7c   : > { %345 = vrot.lane.b32.xlu1 %v333_v10, %s1226_s9  ;;  %v330_v14 = vrot.slane %v300_v11, 7 }
  0x7d   : > { %335 = vrot.lane.b32.xlu0 %v329_v12, %s1226_s9  ;;  %v331_v15 = vrot.slane %v301_v13, 7 }
  0x7e   : > { %v334_v18 = vsel %vm328_vm7, %v330_v14, %v333_v10 }
  0x7f   : > { %v332_v17 = vsel %vm328_vm7, %v329_v12, %v331_v15 }
  0x80   : > { %339 = vrot.lane.b32.xlu1 %v332_v17, %s1226_s9 }
  0x81   : > { %337 = vrot.lane.b32.xlu0 %v330_v14, %s1226_s9 }
  0x84   : > { %341 = vrot.lane.b32.xlu1 %v334_v18, %s1226_s9 }
  0x85   : > { %343 = vrot.lane.b32.xlu0 %v331_v15, %s1226_s9 }
  0x88   : > { %640 = vrot.lane.b32.xlu1 %v635_v20, %s1228_s28 }
  0x89   : > { %758 = vrot.lane.b32.xlu0 %v751_v21, %s1226_s9 }
  0x8c   : > { %760 = vrot.lane.b32.xlu1 %v755_v23, %s1226_s9 }
  0x8d   : > { %833 = vrot.lane.b32.xlu0 %v1010_v25, %s1228_s28 }
  0x90   : > { %835 = vrot.lane.b32.xlu1 %v1011_v28, %s1228_s28 }
  0xcf   : > { %v410_v2 = vpop.permute.xlu1 %409 }
  0xd0   : > { %v408_v31 = vpop.permute.xlu0 %407 }
  0xd1   : > { %v411_v51 = vsel %vm314_vm0, %v408_v31, %v410_v2 }
  0xd3   : > { %v1496_v32 = vpop.permute.xlu1 %464 }
  0xd4   : > { %v1498_v1 = vpop.permute.xlu0 %462 }
  0xd5   : > { %v467_v0 = vsel %vm466_vm11, %v1498_v1, %v1496_v32 }
  0xd7   : > { %v1500_v33 = vpop.permute.xlu1 %565 }
  0xd8   : > { %v1502_v16 = vpop.permute.xlu0 %563 }
  0xd9   : > { %v1507_v34 = vsel %vm314_vm0, %v1502_v16, %v1500_v33 }
  0xdc   : > { %v1509_v35 = vpop.permute.xlu0 %638 }
  0xee   : > { %v346_v5 = vpop.permute.xlu1 %345 }
  0xef   : > { %370 = vst.msk [vmem:[#allocation2 + $0x40] sm:$0x1] %vm316_vm2, %v346_v5  ;;  %v336_v36 = vpop.permute.xlu0 %335 }
  0xf0   : > { %360 = vst.msk [vmem:[#allocation2] sm:$0xfe] %vm359_vm8, %v336_v36 }
  0xf2   : > { %v340_v37 = vpop.permute.xlu1 %339 }
  0xf3   : > { %v338_v38 = vpop.permute.xlu0 %337  ;;  %364 = vst.msk [vmem:[#allocation2 + $0x18] sm:$0xff] %vm363_vm9, %v340_v37 }
  0xf4   : > { %v347_v39 = vsel %vm314_vm0, %v336_v36, %v338_v38  ;;  %362 = vst.msk [vmem:[#allocation2 + $0x10] sm:$0xfe] %vm312_vm4, %v338_v38 }
  0xf5   : > { %361 = vst [vmem:[#allocation2 + $0x8] sm:$0xfe] %v347_v39 }
  0xf6   : > { %v342_v40 = vpop.permute.xlu1 %341  ;;  %v552_v9 = vld [vmem:[#allocation2 + $0x40] sm:$0x1] }
  0xf7   : > { %v344_v41 = vpop.permute.xlu0 %343  ;;  %v1515_v42 = vsel %vm314_vm0, %v340_v37, %v342_v40  ;;  %366 = vst.msk [vmem:[#allocation2 + $0x28] sm:$0xff] %vm314_vm0, %v342_v40  ;;  %v375_v43 = vld [vmem:[#allocation2] sm:$0xff]  ;;  %v579_v20 = vmul.f32 %v1500_v33, %v552_v9 }
  0xf8   : > { %v1518_v44 = vld [vmem:[#allocation2] sm:$0xfc]  ;;  %v349_v45 = vsel %vm314_vm0, %v344_v41, %v346_v5  ;;  %368 = vst.msk [vmem:[#allocation2 + $0x30] sm:$0x1] %vm367_vm10, %v344_v41  ;;  %v415_v46 = vmul.f32 %v408_v31, %v375_v43  ;;  %v1527_v48 = vmul.f32 %v1474_v22, %v375_v43  ;;  %v1531_v49 = vmul.f32 %v1481_v24, %v1515_v42 }
  0xf9   : > { %v1523_v47 = vmul.f32 %v1459_v62, %v1518_v44  ;;  %369 = vst [vmem:[#allocation2 + $0x38] sm:$0x1] %v349_v45  ;;  %v471_v58 = vmul.f32 %v1498_v1, %v375_v43  ;;  %v419_v3 = vmul.f32 %v411_v51, %v1515_v42  ;;  %v508_v4 = vld [vmem:[#allocation2] sm:$0xfe]  ;;  %v475_v13 = vmul.f32 %v467_v0, %v1515_v42 }
  0xfa   : > { %427 = vrot.lane.b32.xlu0 %v415_v46, %s1229_s10  ;;  %v1537_v55 = vld [vmem:[#allocation2 + $0x18] sm:$0xff]  ;;  %v571_v11 = vmul.f32 %v1502_v16, %v508_v4  ;;  %v1567_v12 = vpop.permute.xlu1 %640  ;;  %v646_v23 = vmul.f32 %v1509_v35, %v508_v4  ;;  %v602_v37 = vrot.slane %v579_v20, 1 }
  0xfb   : > { %v395_v50 = vld [vmem:[#allocation2 + $0x10] sm:$0xff]  ;;  %v418_v59 = vmul.f32 %v408_v31, %v1537_v55  ;;  %v574_v7 = vmul.f32 %v1502_v16, %v1537_v55  ;;  %v1575_v17 = vmul.f32 %v1509_v35, %v1537_v55  ;;  %v474_v18 = vmul.f32 %v1498_v1, %v1537_v55  ;;  %v1583_v25 = vpop.permute.xlu0 %758 }
  0xfc   : > { %v417_v52 = vmul.f32 %v410_v2, %v395_v50  ;;  %v1534_v53 = vld [vmem:[#allocation2 + $0x8] sm:$0xff]  ;;  %v473_v61 = vmul.f32 %v1496_v32, %v395_v50  ;;  %v551_v10 = vld [vmem:[#allocation2 + $0x10] sm:$0xfe]  ;;  %v1602_v38 = vmul.f32 %v1583_v25, %v1518_v44  ;;  %v664_v40 = vrot.slane %v646_v23, 1 }
  0xfd   : > { %v416_v54 = vmul.f32 %v411_v51, %v1534_v53  ;;  %v472_v6 = vmul.f32 %v467_v0, %v1534_v53  ;;  %v590_v19 = vrot.slane %v574_v7, 1  ;;  %v573_v21 = vmul.f32 %v1500_v33, %v551_v10  ;;  %v1615_v50 = vld [vmem:[#allocation2 + $0x8] sm:$0xfe] }
  0xfe   : > { %431 = vrot.lane.b32.xlu0 %v417_v52, %s1229_s10  ;;  %v1549_v60 = vld [vmem:[#allocation2 + $0x28] sm:$0xff]  ;;  %v1586_v26 = vmul.f32 %v1567_v12, %v551_v10  ;;  %v1608_v43 = vmul.f32 %v1583_v25, %v1537_v55  ;;  %v1619_v51 = vmul.f32 %v1481_v24, %v1534_v53  ;;  %v523_v24 = vmul.f32 %v1490_v29, %v1515_v42 }
  0xff   : > { %v1540_v56 = vld [vmem:[#allocation2 + $0x30] sm:$0x3]  ;;  %429 = vrot.lane.b32.xlu1 %v416_v54, %s1229_s10  ;;  %v420_v63 = vmul.f32 %v410_v2, %v1549_v60  ;;  %v576_v14 = vmul.f32 %v1500_v33, %v1549_v60  ;;  %v1590_v28 = vmul.f32 %v1567_v12, %v1549_v60  ;;  %v589_v2 = vrot.slane %v571_v11, 1 }
 0x100   : > { %v1545_v57 = vmul.f32 %v1459_v62, %v1540_v56  ;;  %v510_v8 = vld [vmem:[#allocation2 + $0x30] sm:$0x1]  ;;  %v1595_v33 = vmul.f32 %v1567_v12, %v552_v9  ;;  %v476_v36 = vmul.f32 %v1496_v32, %v1549_v60  ;;  %v595_v39 = vrot.slane %v573_v21, 1  ;;  %v1613_v46 = vld [vmem:[#allocation2 + $0x38] sm:$0x1] }
 0x101   : > { %v577_v15 = vmul.f32 %v1502_v16, %v510_v8  ;;  %v596_v31 = vrot.slane %v576_v14, 1  ;;  %v665_v16 = vrot.slane %v1575_v17, 1  ;;  %v591_v5 = vsel %vm532_vm12, %v589_v2, %v590_v19 }
 0x102   : > { %483 = vrot.lane.b32.xlu0 %v471_v58, %s1230_s6  ;;  %v652_v41 = vmul.f32 %v1509_v35, %v510_v8  ;;  %v670_v32 = vrot.slane %v1586_v26, 1  ;;  %v671_v45 = vrot.slane %v1590_v28, 1  ;;  %v524_v53 = vmul.f32 %v1486_v27, %v510_v8 }
 0x103   : > { %433 = vrot.lane.b32.xlu1 %v418_v59, %s1229_s10  ;;  %v598_v1 = vrot.slane %v577_v15, 1  ;;  %v597_v52 = vsel %vm532_vm12, %v595_v39, %v596_v31  ;;  %v666_v58 = vsel %vm532_vm12, %v664_v40, %v665_v16  ;;  %v1628_v59 = vmul.f32 %v1474_v22, %v1537_v55 }
 0x104   : > { %v673_v0 = vrot.slane %v652_v41, 1  ;;  %v520_v22 = vmul.f32 %v1486_v27, %v508_v4  ;;  %v521_v7 = vmul.f32 %v1490_v29, %v1615_v50  ;;  %v537_v10 = vrot.slane %v523_v24, 1 }
 0x105   : > { %v599_v54 = vsel %vm532_vm12, %v590_v19, %v598_v1  ;;  %v539_v11 = vrot.slane %v524_v53, 1  ;;  %v717_v8 = vmul.f32 %v1459_v62, %v1537_v55  ;;  %v718_v19 = vmul.f32 %v1494_v30, %v1515_v42  ;;  %v1703_v53 = vld [vmem:[#allocation2 + $0x40] sm:$0x3] }
 0x106   : > { %487 = vrot.lane.b32.xlu0 %v473_v61, %s1230_s6  ;;  %v603_v61 = vsel %vm532_vm12, %v596_v31, %v602_v37  ;;  %v533_v15 = vrot.slane %v520_v22, 1  ;;  %v734_v21 = vrot.slane %v1545_v57, 2  ;;  %v746_v31 = vld [vmem:[#allocation2 + $0x10] sm:$0xfc]  ;;  %v672_v40 = vsel %vm532_vm12, %v670_v32, %v671_v45 }
 0x107   : > { %437 = vrot.lane.b32.xlu1 %v420_v63, %s1229_s10  ;;  %v522_v63 = vmul.f32 %v1486_v27, %v1537_v55  ;;  %v1651_v27 = vpop.permute.xlu1 %760  ;;  %v729_v20 = vrot.slane %v717_v8, 2  ;;  %v732_v2 = vrot.slane %v718_v19, 2  ;;  %v784_v41 = vrot.slane %v1602_v38, 2 }
 0x108   : > { %v768_v37 = vmul.f32 %v1651_v27, %v746_v31  ;;  %v771_v39 = vmul.f32 %v1651_v27, %v1549_v60  ;;  %v674_v32 = vsel %vm532_vm12, %v665_v16, %v673_v0  ;;  %v774_v16 = vmul.f32 %v1651_v27, %v1703_v53 }
 0x109   : > { %v534_v9 = vrot.slane %v522_v63, 1  ;;  %v1671_v1 = vsel %vm727_vm13, %v729_v20, %v734_v21  ;;  %v677_v63 = vrot.slane %v1595_v33, 1  ;;  %v575_v21 = vmul.f32 %v1507_v34, %v1515_v42 }
 0x10a   : > { %435 = vrot.lane.b32.xlu0 %v419_v3, %s1229_s10  ;;  %v1637_v3 = vld [vmem:[#allocation2 + $0x38] sm:$0x3]  ;;  %v790_v17 = vrot.slane %v768_v37, 2 }
 0x10b   : > { %485 = vrot.lane.b32.xlu1 %v472_v6, %s1230_s6  ;;  %v525_v6 = vmul.f32 %v1490_v29, %v1613_v46  ;;  %v1654_v29 = vsel %vm532_vm12, %v534_v9, %v539_v11  ;;  %v720_v4 = vmul.f32 %v1494_v30, %v1637_v3  ;;  %v1664_v23 = vsel %vm532_vm12, %v533_v15, %v534_v9 }
 0x10d   : > { %v541_v14 = vrot.slane %v525_v6, 1  ;;  %v1705_v6 = vpop.permute.xlu1 %835 }
 0x10e   : > { %491 = vrot.lane.b32.xlu0 %v475_v13, %s1230_s6  ;;  %v1647_v13 = vld [vmem:[#allocation2 + $0x8] sm:$0xfc]  ;;  %v1718_v0 = vmul.f32 %v1705_v6, %v1549_v60  ;;  %v578_v60 = vmul.f32 %v1507_v34, %v1613_v46 }
 0x10f   : > { %489 = vrot.lane.b32.xlu1 %v474_v18, %s1230_s6  ;;  %v536_v18 = vrot.slane %v521_v7, 1  ;;  %v1661_v62 = vsel %vm532_vm12, %v537_v10, %v541_v14  ;;  %v716_v57 = vmul.f32 %v1494_v30, %v1647_v13  ;;  %v791_v7 = vrot.slane %v771_v39, 2 }
 0x111   : > { %v1667_v26 = vsel %vm532_vm12, %v536_v18, %v537_v10  ;;  %v792_v9 = vsel %vm727_vm13, %v790_v17, %v791_v7  ;;  %v866_v18 = vrot.slane %v1718_v0, 2 }
 0x112   : > { %604 = vrot.lane.b32.xlu0 %v591_v5, %s1229_s10  ;;  %v736_v5 = vrot.slane %v720_v4, 2  ;;  %v572_v4 = vmul.f32 %v1507_v34, %v1615_v50  ;;  %v593_v34 = vrot.slane %v575_v21, 1 }
 0x113   : > { %493 = vrot.lane.b32.xlu1 %v476_v36, %s1230_s6  ;;  %v728_v36 = vrot.slane %v1523_v47, 2  ;;  %v731_v47 = vrot.slane %v716_v57, 2 }
 0x114   : > { %v592_v37 = vrot.slane %v572_v4, 1 }
 0x115   : > { %v1688_v30 = vsel %vm727_vm13, %v728_v36, %v729_v20  ;;  %v1698_v38 = vsel %vm727_vm13, %v731_v47, %v732_v2  ;;  %v642_v20 = vsel %vm466_vm11, %v1509_v35, %v1567_v12 }
 0x116   : > { %608 = vrot.lane.b32.xlu0 %v597_v52, %s1229_s10  ;;  %v834_v52 = vpop.permute.xlu0 %833  ;;  %v653_v57 = vmul.f32 %v642_v20, %v1613_v46  ;;  %v650_v35 = vmul.f32 %v642_v20, %v1515_v42  ;;  %v647_v12 = vmul.f32 %v642_v20, %v1615_v50 }
 0x117   : > { %610 = vrot.lane.b32.xlu1 %v599_v54, %s1229_s10  ;;  %v785_v54 = vrot.slane %v1608_v43, 2  ;;  %v841_v43 = vmul.f32 %v834_v52, %v1518_v44  ;;  %v844_v24 = vmul.f32 %v834_v52, %v1537_v55  ;;  %v678_v44 = vsel %vm532_vm12, %v671_v45, %v677_v63 }
 0x118   : > { %v843_v55 = vmul.f32 %v1705_v6, %v746_v31  ;;  %v847_v8 = vmul.f32 %v834_v52, %v1540_v56  ;;  %v797_v45 = vrot.slane %v774_v16, 2  ;;  %v675_v46 = vrot.slane %v653_v57, 1 }
 0x119   : > { %v786_v22 = vsel %vm727_vm13, %v784_v41, %v785_v54  ;;  %v859_v10 = vrot.slane %v841_v43, 2  ;;  %v860_v11 = vrot.slane %v844_v24, 2  ;;  %v594_v41 = vsel %vm532_vm12, %v592_v37, %v593_v34 }
 0x11a   : > { %679 = vrot.lane.b32.xlu0 %v666_v58, %s1230_s6  ;;  %v1685_v58 = vsel %vm727_vm13, %v732_v2, %v736_v5  ;;  %v865_v15 = vrot.slane %v843_v55, 2  ;;  %v798_v19 = vsel %vm727_vm13, %v791_v7, %v797_v45  ;;  %v762_v2 = vsel %vm314_vm0, %v1583_v25, %v1651_v27 }
 0x11b   : > { %614 = vrot.lane.b32.xlu1 %v603_v61, %s1229_s10  ;;  %v772_v61 = vmul.f32 %v1583_v25, %v1540_v56  ;;  %v861_v14 = vsel %vm727_vm13, %v859_v10, %v860_v11  ;;  %v868_v56 = vrot.slane %v847_v8, 2  ;;  %v600_v5 = vrot.slane %v578_v60, 1 }
 0x11c   : > { %v867_v31 = vsel %vm727_vm13, %v865_v15, %v866_v18  ;;  %v770_v39 = vmul.f32 %v762_v2, %v1515_v42  ;;  %v837_v25 = vsel %vm466_vm11, %v834_v52, %v1705_v6  ;;  %v667_v47 = vrot.slane %v647_v12, 1 }
 0x11d   : > { %v793_v33 = vrot.slane %v772_v61, 2  ;;  %v869_v36 = vsel %vm727_vm13, %v860_v11, %v868_v56  ;;  %v601_v27 = vsel %vm532_vm12, %v593_v34, %v600_v5  ;;  %v767_v50 = vmul.f32 %v762_v2, %v1647_v13 }
 0x11e   : > { %683 = vrot.lane.b32.xlu0 %v672_v40, %s1230_s6  ;;  %v773_v40 = vmul.f32 %v762_v2, %v1637_v3  ;;  %v788_v61 = vrot.slane %v770_v39, 2  ;;  %v845_v52 = vmul.f32 %v837_v25, %v1515_v42  ;;  %v848_v63 = vmul.f32 %v837_v25, %v1637_v3 }
 0x11f   : > { %685 = vrot.lane.b32.xlu1 %v674_v32, %s1230_s6  ;;  %v794_v28 = vsel %vm727_vm13, %v785_v54, %v793_v33  ;;  %v668_v54 = vrot.slane %v650_v35, 1  ;;  %v842_v17 = vmul.f32 %v837_v25, %v1647_v13  ;;  %v849_v33 = vmul.f32 %v1705_v6, %v1703_v53 }
 0x120   : > { %v795_v43 = vrot.slane %v773_v40, 2  ;;  %v863_v16 = vrot.slane %v845_v52, 2 }
 0x121   : > { %v676_v32 = vsel %vm532_vm12, %v668_v54, %v675_v46  ;;  %v669_v24 = vsel %vm532_vm12, %v667_v47, %v668_v54  ;;  %v862_v3 = vrot.slane %v842_v17, 2  ;;  %v872_v0 = vrot.slane %v849_v33, 2 }
 0x122   : > { %799 = vrot.lane.b32.xlu0 %v786_v22, %s1229_s10  ;;  %v787_v22 = vrot.slane %v767_v50, 2  ;;  %v796_v7 = vsel %vm727_vm13, %v788_v61, %v795_v43 }
 0x123   : > { %689 = vrot.lane.b32.xlu1 %v678_v44, %s1230_s6  ;;  %v870_v44 = vrot.slane %v848_v63, 2  ;;  %v864_v13 = vsel %vm727_vm13, %v862_v3, %v863_v16 }
 0x124   : > { %v789_v42 = vsel %vm727_vm13, %v787_v22, %v788_v61 }
 0x125   : > { %v871_v55 = vsel %vm727_vm13, %v863_v16, %v870_v44 }
 0x126   : > { %803 = vrot.lane.b32.xlu0 %v792_v9, %s1229_s10  ;;  %v873_v9 = vsel %vm727_vm13, %v866_v18, %v872_v0 }
 0x127   : > { %805 = vrot.lane.b32.xlu1 %v794_v28, %s1229_s10 }
 0x12a   : > { %874 = vrot.lane.b32.xlu0 %v861_v14, %s1230_s6 }
 0x12b   : > { %809 = vrot.lane.b32.xlu1 %v798_v19, %s1229_s10 }
 0x12e   : > { %878 = vrot.lane.b32.xlu0 %v867_v31, %s1230_s6 }
 0x12f   : > { %880 = vrot.lane.b32.xlu1 %v869_v36, %s1230_s6 }
 0x132   : > { %612 = vrot.lane.b32.xlu0 %v601_v27, %s1229_s10 }
 0x133   : > { %606 = vrot.lane.b32.xlu1 %v594_v41, %s1229_s10 }
 0x136   : > { %687 = vrot.lane.b32.xlu0 %v676_v32, %s1230_s6 }
 0x137   : > { %681 = vrot.lane.b32.xlu1 %v669_v24, %s1230_s6 }
 0x13a   : > { %807 = vrot.lane.b32.xlu0 %v796_v7, %s1229_s10 }
 0x13b   : > { %801 = vrot.lane.b32.xlu1 %v789_v42, %s1229_s10 }
 0x13e   : > { %882 = vrot.lane.b32.xlu0 %v871_v55, %s1230_s6 }
 0x13f   : > { %876 = vrot.lane.b32.xlu1 %v864_v13, %s1230_s6 }
 0x143   : > { %884 = vrot.lane.b32.xlu1 %v873_v9, %s1230_s6 }
 0x16c   : > { %v428_v53 = vpop.permute.xlu0 %427 }
 0x170   : > { %v432_v6 = vpop.permute.xlu0 %431 }
 0x171   : > { %v430_v10 = vpop.permute.xlu1 %429 }
 0x172   : > { %v440_v14 = vsel %vm439_vm14, %v428_v53, %v430_v10  ;;  %v441_v15 = vsel %vm439_vm14, %v430_v10, %v432_v6 }
 0x173   : > { %v448_v19 = vadd.f32 %v440_v14, %v1527_v48  ;;  %v449_v18 = vadd.f32 %v441_v15, %v1619_v51 }
 0x174   : > { %v484_v11 = vpop.permute.xlu0 %483 }
 0x175   : > { %v434_v8 = vpop.permute.xlu1 %433 }
 0x178   : > { %v488_v28 = vpop.permute.xlu0 %487 }
 0x179   : > { %v438_v45 = vpop.permute.xlu1 %437 }
 0x17c   : > { %v436_v60 = vpop.permute.xlu0 %435 }
 0x17d   : > { %v486_v56 = vpop.permute.xlu1 %485  ;;  %v442_v4 = vsel %vm439_vm14, %v434_v8, %v436_v60  ;;  %v443_v48 = vsel %vm439_vm14, %v436_v60, %v438_v45 }
 0x17e   : > { %v496_v20 = vsel %vm495_vm15, %v484_v11, %v486_v56  ;;  %v497_v21 = vsel %vm495_vm15, %v486_v56, %v488_v28  ;;  %v450_v57 = vadd.f32 %v442_v4, %v1628_v59  ;;  %v451_v39 = vadd.f32 %v443_v48, %v1531_v49 }
 0x17f   : > { %v504_v2 = vadd.f32 %v496_v20, %v448_v19  ;;  %v505_v31 = vadd.f32 %v497_v21, %v449_v18 }
 0x180   : > { %v492_v5 = vpop.permute.xlu0 %491 }
 0x181   : > { %v490_v36 = vpop.permute.xlu1 %489  ;;  %v547_v37 = vadd.f32 %v1664_v23, %v504_v2  ;;  %v548_v35 = vadd.f32 %v1667_v26, %v505_v31 }
 0x182   : > { %v498_v51 = vsel %vm495_vm15, %v490_v36, %v492_v5 }
 0x183   : > { %v506_v12 = vadd.f32 %v498_v51, %v450_v57 }
 0x184   : > { %v605_v34 = vpop.permute.xlu0 %604 }
 0x185   : > { %v494_v25 = vpop.permute.xlu1 %493  ;;  %v549_v27 = vadd.f32 %v1654_v29, %v506_v12 }
 0x186   : > { %v499_v46 = vsel %vm495_vm15, %v492_v5, %v494_v25 }
 0x187   : > { %v507_v40 = vadd.f32 %v499_v46, %v451_v39 }
 0x188   : > { %v609_v59 = vpop.permute.xlu0 %608 }
 0x189   : > { %v611_v41 = vpop.permute.xlu1 %610  ;;  %v550_v23 = vadd.f32 %v1661_v62, %v507_v40 }
 0x18c   : > { %v680_v54 = vpop.permute.xlu0 %679 }
 0x18d   : > { %v615_v26 = vpop.permute.xlu1 %614 }
 0x190   : > { %v684_v47 = vpop.permute.xlu0 %683 }
 0x191   : > { %v686_v50 = vpop.permute.xlu1 %685 }
 0x194   : > { %v800_v61 = vpop.permute.xlu0 %799 }
 0x195   : > { %v690_v32 = vpop.permute.xlu1 %689 }
 0x198   : > { %v804_v43 = vpop.permute.xlu0 %803 }
 0x199   : > { %v806_v52 = vpop.permute.xlu1 %805 }
 0x19c   : > { %v875_v63 = vpop.permute.xlu0 %874 }
 0x19d   : > { %v810_v49 = vpop.permute.xlu1 %809 }
 0x1a0   : > { %v879_v24 = vpop.permute.xlu0 %878 }
 0x1a1   : > { %v881_v22 = vpop.permute.xlu1 %880 }
 0x1a4   : > { %v613_v29 = vpop.permute.xlu0 %612 }
 0x1a5   : > { %v618_v17 = vsel %vm439_vm14, %v611_v41, %v613_v29  ;;  %v619_v7 = vsel %vm439_vm14, %v613_v29, %v615_v26  ;;  %v607_v16 = vpop.permute.xlu1 %606 }
 0x1a6   : > { %v616_v62 = vsel %vm439_vm14, %v605_v34, %v607_v16  ;;  %v617_v44 = vsel %vm439_vm14, %v607_v16, %v609_v59  ;;  %v626_v33 = vadd.f32 %v618_v17, %v549_v27  ;;  %v627_v42 = vadd.f32 %v619_v7, %v550_v23 }
 0x1a7   : > { %v624_v55 = vadd.f32 %v616_v62, %v547_v37  ;;  %v625_v13 = vadd.f32 %v617_v44, %v548_v35 }
 0x1a8   : > { %v688_v3 = vpop.permute.xlu0 %687 }
 0x1a9   : > { %v693_v0 = vsel %vm495_vm15, %v686_v50, %v688_v3  ;;  %v694_v9 = vsel %vm495_vm15, %v688_v3, %v690_v32  ;;  %v682_v53 = vpop.permute.xlu1 %681 }
 0x1aa   : > { %v701_v6 = vadd.f32 %v693_v0, %v626_v33  ;;  %v702_v10 = vadd.f32 %v694_v9, %v627_v42  ;;  %v691_v11 = vsel %vm495_vm15, %v680_v54, %v682_v53  ;;  %v692_v8 = vsel %vm495_vm15, %v682_v53, %v684_v47 }
 0x1ab   : > { %v699_v28 = vadd.f32 %v691_v11, %v624_v55  ;;  %v700_v45 = vadd.f32 %v692_v8, %v625_v13 }
 0x1ac   : > { %v808_v14 = vpop.permute.xlu0 %807  ;;  %v744_v15 = vadd.f32 %v1671_v1, %v701_v6  ;;  %v745_v60 = vadd.f32 %v1685_v58, %v702_v10 }
 0x1ad   : > { %v813_v19 = vsel %vm439_vm14, %v806_v52, %v808_v14  ;;  %v742_v18 = vadd.f32 %v1688_v30, %v699_v28  ;;  %v743_v56 = vadd.f32 %v1698_v38, %v700_v45  ;;  %v802_v4 = vpop.permute.xlu1 %801  ;;  %v814_v36 = vsel %vm439_vm14, %v808_v14, %v810_v49 }
 0x1ae   : > { %v811_v20 = vsel %vm439_vm14, %v800_v61, %v802_v4  ;;  %v812_v21 = vsel %vm439_vm14, %v802_v4, %v804_v43  ;;  %v821_v2 = vadd.f32 %v813_v19, %v744_v15  ;;  %v822_v51 = vadd.f32 %v814_v36, %v745_v60 }
 0x1af   : > { %v819_v5 = vadd.f32 %v811_v20, %v742_v18  ;;  %v820_v57 = vadd.f32 %v812_v21, %v743_v56 }
 0x1b0   : > { %v883_v31 = vpop.permute.xlu0 %882 }
 0x1b1   : > { %v888_v1 = vsel %vm495_vm15, %v881_v22, %v883_v31  ;;  %v877_v58 = vpop.permute.xlu1 %876 }
 0x1b2   : > { %v896_v37 = vadd.f32 %v888_v1, %v821_v2  ;;  %v886_v30 = vsel %vm495_vm15, %v875_v63, %v877_v58  ;;  %v887_v38 = vsel %vm495_vm15, %v877_v58, %v879_v24 }
 0x1b3   : > { %v894_v35 = vadd.f32 %v886_v30, %v819_v5  ;;  %v895_v48 = vadd.f32 %v887_v38, %v820_v57 }
 0x1b4   : > { %900 = vst [vmem:[%s230_s7 + $0x10] sm:$0xff] %v896_v37 }
 0x1b5   : > { %898 = vst [vmem:[%s230_s7] sm:$0xff] %v894_v35  ;;  %899 = vst [vmem:[%s230_s7 + $0x8] sm:$0xff] %v895_v48  ;;  %v885_v12 = vpop.permute.xlu1 %884 }
 0x1b6   : > { %v889_v34 = vsel %vm495_vm15, %v883_v31, %v885_v12 }
 0x1b7   : > { %v897_v39 = vadd.f32 %v889_v34, %v822_v51 }
 0x1b9   : > { %901 = vst [vmem:[%s230_s7 + $0x18] sm:$0xff] %v897_v39 }
 0x1ba   : > { %1163 = shalt.err (!%p1160_p7)
}
 0x1bb   : > { %s1164_s12 = scalar_lea.hbm %s1821_s20, 512  ;;  %s1168_s10 = scalar_lea.hbm %s1870_s4, 1024 }
 0x1bc   : > { %p1165_p9 = scmp.ne.s32.totalorder %s1821_s20, %s1164_s12  ;;  %p1169_p5 = scmp.lt.u32.totalorder %s1821_s20, %s1870_s4 }
 0x1bd   : > { %p1170_p11 = scmp.lt.u32.totalorder %s1168_s10, %s1164_s12  ;;  %p1172_p4 = scmp.lt.u32.totalorder %s1164_s12, %s1821_s20 }
 0x1be   : > { %p1166_p1 = pnand %p1165_p9, %p1352_p12 }
 0x1bf   : > { %p1171_p2 = por %p1170_p11, %p1169_p5 }
 0x1c0   : > { %p1167_p0 = pneg %p1166_p1 }
 0x1c1   : > { %p1173_p6 = por %p1172_p4, %p1171_p2 }
 0x1c3   : > { %p1174_p8 = pnand %p1173_p6, %p1167_p0 }
 0x1c5   : > { %1177 = shalt.err (!%p1174_p8)
}
 0x1c6   : > { %s1232_s8 = smov 256  }
 0x1c7   : > { %1025 = dma.vmem_to_hbm [thread:$0]  (%p1352_p12), %s1815_s26, 512, %s1821_s20, %s903_s5, %s1232_s8, %s1232_s8, %s1226_s9  }
 0x1c8 PF: > { %s931_s25 = sand.u32 1, %s1208_s15   ;;  %p1885_p10 = scmp.ne.s32.totalorder %s1875_s22, 0 }
 0x1c9   : > { %p1886_p13 = scmp.ge.s32.totalorder %s1220_s18, 2  ;;  %s932_s14 = scalar_lea.sflag [#allocation5], %s931_s25 }
 0x1cb   : > { %p1036_p3 = pnand %p1886_p13, %p1885_p10 }
 0x1cd   : > { %1203 = dma.done.wait (!%p1036_p3), %s932_s14, 512  }
 0x1ce   : > { %1205 = vsyncadd (!%p1036_p3), %s932_s14, 4294966784  ;;  %p18_p7 = scmp.ge.s32.totalorder %s1314_s27, 4   ;;  %s1887_s15 = smov %s1212_s16 }
 0x1cf   : > { %s1888_s16 = smov %s1216_s17  ;;  %s1889_s17 = smov %s1348_s24 }
 0x1d0   : > { %s1890_s18 = smov %s1314_s27  ;;  %20 = sbr.rel (!%p18_p7) target bundleno = 6 (0x6), region = 86 }
 0x1d7   :  { %937 = vsyncpa [#allocation4], 1 }
 0x1d8   :  { %939 = vsyncpa [#allocation4 + $0x1], 1 }
 0x1d9   :  { %940 = vsyncpa [#allocation7], 1 }
 0x1da   :  { %941 = vsyncpa [#allocation5], 1 }
 0x1db   :  { %943 = vsyncpa [#allocation5 + $0x1], 1 }

</bundles_post_ra>
